<compile_context>
chip_gen: v7x
topology: tpu7x:2x2x1
jax: 0.10.0
libtpu: 0.0.40
codegen_flags: <defaults>
</compile_context>

<pallas_src>
import functools

import jax
import jax.numpy as jnp
from jax.experimental import pallas as pl
from jax.experimental.pallas import tpu as pltpu


def _round_up(x, m):
    return (x + m - 1) // m * m


def _detr_loss_kernel(pred_ref, logits_ref, labels_ref, pred_t_ref, target_t_ref,
                      out_ref, min_acc, acc_sm, *,
                      num_rows, tile_m, tile_n, num_classes,
                      weight_set, weight_bbox, weight_class):
    i = pl.program_id(0)              # row-tile index   ("parallel")
    j = pl.program_id(1)              # column-tile index ("arbitrary" reduction)
    n_col = pl.num_programs(1)
    M = num_rows
    inv_m = 1.0 / M

    # -------- init + classification loss (once per row tile) --------
    @pl.when(j == 0)
    def _init():
        min_acc[...] = jnp.full((tile_m, 128), jnp.inf, jnp.float32)
        logits = logits_ref[...]                                     # (TM, C)
        labels = labels_ref[...]                                     # (TM, 1) int32
        row_ids = i * tile_m + jax.lax.broadcasted_iota(jnp.int32, (tile_m, 1), 0)
        row_valid = row_ids < M
        row_max = jnp.max(logits, axis=-1, keepdims=True)
        shifted = logits - row_max
        lse = jnp.log(jnp.sum(jnp.exp(shifted), axis=-1, keepdims=True)) + row_max
        cls_ids = jax.lax.broadcasted_iota(jnp.int32, (tile_m, num_classes), 1)
        picked = jnp.sum(jnp.where(cls_ids == labels, logits, 0.0),
                         axis=-1, keepdims=True)
        ce = jnp.where(row_valid, lse - picked, 0.0)                 # padded rows -> 0
        acc_sm[0] = weight_class * inv_m * inv_m * jnp.sum(ce)

    # -------- set loss: squared-distance tile (MXU cross term) + online min --------
    pred = pred_ref[...]              # (TM, 8)   feature dim zero-padded 2 -> 8
    tgt_t = target_t_ref[...]         # (8, TN)
    cross = jnp.dot(pred, tgt_t, preferred_element_type=jnp.float32,
                    precision=jax.lax.Precision.HIGHEST)             # (TM, TN) on MXU
    p2 = jnp.sum(pred * pred, axis=-1, keepdims=True)                # (TM, 1)
    t2 = jnp.sum(tgt_t * tgt_t, axis=0, keepdims=True)               # (1, TN)
    d2 = jnp.maximum(p2 + t2 - 2.0 * cross, 0.0)                     # clamp fp cancel
    col_ids = j * tile_n + jax.lax.broadcasted_iota(jnp.int32, (1, tile_n), 1)
    d2 = jnp.where(col_ids < M, d2, jnp.inf)                         # mask padded cols
    m = min_acc[...]
    for s in range(tile_n // 128):    # VPU element-wise mins over 128-lane slabs
        m = jnp.minimum(m, d2[:, s * 128:(s + 1) * 128])
    min_acc[...] = m

    # -------- bbox L1, lane-dense on the (8, M) layout (row tile 0 only) --------
    @pl.when(i == 0)
    def _bbox():
        diff = jnp.abs(pred_t_ref[...] - target_t_ref[...])          # padded slots are 0
        acc_sm[0] += weight_bbox * inv_m * jnp.sum(diff)

    # -------- finalize (last column step of this row tile) --------
    @pl.when(j == n_col - 1)
    def _finalize():
        row_ids = i * tile_m + jax.lax.broadcasted_iota(jnp.int32, (tile_m, 1), 0)
        row_valid = row_ids < M
        row_min = jnp.min(min_acc[...], axis=-1, keepdims=True)      # one XLU reduce
        dist = jnp.where(row_valid, jnp.sqrt(row_min), 0.0)          # TM sqrts only
        total = acc_sm[0] + weight_set * inv_m * jnp.sum(dist)
        out_ref[...] = jnp.full((1, 1, 1), total, jnp.float32)


def time_series_detr_loss(pred_bbox, target_bbox, class_logits, target_classes, *,
                          num_classes, weight_set=1.0, weight_bbox=1.0,
                          weight_class=1.0, row_tile=256, col_tile=512):
    """JAX/Pallas equivalent of TimeSeriesDetrLoss.forward.

    pred_bbox:      (B, N, 2) float
    target_bbox:    (B, N, 2) float
    class_logits:   (B, N, C) float
    target_classes: (B, N)    int class labels
    returns:        scalar float32 combined loss
    """
    B, N, feat = pred_bbox.shape
    assert feat == 2
    M = B * N
    C = num_classes
    KP = 8                                     # feature dim padded 2 -> 8 for the MXU
    f32 = jnp.float32

    pred = pred_bbox.reshape(M, feat).astype(f32)
    tgt = target_bbox.reshape(M, feat).astype(f32)

    # Row tiling (pred rows / logits / labels): sublane-aligned.
    mp_r = _round_up(M, 8)
    tm = row_tile if mp_r >= row_tile else mp_r
    mp_r = _round_up(M, tm)
    # Column tiling (transposed pred/target): lane-aligned (multiple of 128).
    mp_c = _round_up(M, 128)
    tn = col_tile if mp_c >= col_tile else mp_c
    mp_c = _round_up(M, tn)

    pred_rows = jnp.zeros((mp_r, KP), f32).at[:M, :feat].set(pred)
    pred_cols = jnp.zeros((KP, mp_c), f32).at[:feat, :M].set(pred.T)
    tgt_cols = jnp.zeros((KP, mp_c), f32).at[:feat, :M].set(tgt.T)
    logits = jnp.zeros((mp_r, C), f32).at[:M].set(
        class_logits.reshape(M, C).astype(f32))
    labels = jnp.zeros((mp_r, 1), jnp.int32).at[:M, 0].set(
        target_classes.reshape(M).astype(jnp.int32))

    grid = (mp_r // tm, mp_c // tn)
    kernel = functools.partial(
        _detr_loss_kernel, num_rows=M, tile_m=tm, tile_n=tn, num_classes=C,
        weight_set=float(weight_set), weight_bbox=float(weight_bbox),
        weight_class=float(weight_class))

    partials = pl.pallas_call(
        kernel,
        out_shape=jax.ShapeDtypeStruct((grid[0], 1, 1), f32),
        grid_spec=pltpu.PrefetchScalarGridSpec(
            num_scalar_prefetch=0,
            grid=grid,
            in_specs=[
                pl.BlockSpec((tm, KP), lambda i, j: (i, 0)),   # pred (row tiles)
                pl.BlockSpec((tm, C), lambda i, j: (i, 0)),    # class logits
                pl.BlockSpec((tm, 1), lambda i, j: (i, 0)),    # int labels
                pl.BlockSpec((KP, tn), lambda i, j: (0, j)),   # pred^T (col tiles)
                pl.BlockSpec((KP, tn), lambda i, j: (0, j)),   # target^T (col tiles)
            ],
            out_specs=pl.BlockSpec((1, 1, 1), lambda i, j: (i, 0, 0)),
            scratch_shapes=[pltpu.VMEM((tm, 128), f32),        # running min (squared)
                            pltpu.SMEM((1,), f32)],            # scalar partial accumulator
        ),
        compiler_params=pltpu.CompilerParams(
            dimension_semantics=("parallel", "arbitrary")),
    )(pred_rows, logits, labels, pred_cols, tgt_cols)

    return jnp.sum(partials)


if __name__ == "__main__":
    # Small shapes consistent with the module: batch=2, num_obj=8, num_classes=4.
    B, N, C = 2, 8, 4
    key = jax.random.PRNGKey(0)
    k1, k2, k3, k4 = jax.random.split(key, 4)

    pred_bbox = jax.random.normal(k1, (B, N, 2), dtype=jnp.float32)
    target_bbox = jax.random.normal(k2, (B, N, 2), dtype=jnp.float32)
    class_logits = jax.random.normal(k3, (B, N, C), dtype=jnp.float32)
    target_classes = jax.random.randint(k4, (B, N), 0, C, dtype=jnp.int32)

    loss = time_series_detr_loss(
        pred_bbox, target_bbox, class_logits, target_classes,
        num_classes=C, weight_set=1.0, weight_bbox=1.0, weight_class=1.0)
    loss = jax.block_until_ready(loss)

    # Pure-JAX reference (same math as the PyTorch module, no Pallas).
    M = B * N
    p = pred_bbox.reshape(M, 2)
    t = target_bbox.reshape(M, 2)
    d = jnp.sqrt(jnp.sum((p[:, None, :] - t[None, :, :]) ** 2, axis=-1))
    set_ref = jnp.sum(jnp.min(d, axis=-1)) / M
    bbox_ref = jnp.sum(jnp.abs(p - t)) / M
    lg = class_logits.reshape(M, C)
    lbl = target_classes.reshape(M)
    ce_ref = jnp.mean(jax.nn.logsumexp(lg, axis=-1)
                      - jnp.take_along_axis(lg, lbl[:, None], axis=-1)[:, 0]) / M
    ref = set_ref + bbox_ref + ce_ref
    assert jnp.allclose(loss, ref, rtol=1e-4, atol=1e-4), (loss, ref)

    print("KERNEL_OK")
</pallas_src>

<mosaic_0001>
module attributes {stable_mosaic.version = 11 : i64} {
  func.func @_detr_loss_kernel(%arg0: i32, %arg1: i32, %arg2: memref<16x8xf32, #tpu.memory_space<vmem>>, %arg3: memref<16x4xf32, #tpu.memory_space<vmem>>, %arg4: memref<16x1xi32, #tpu.memory_space<vmem>>, %arg5: memref<8x128xf32, #tpu.memory_space<vmem>>, %arg6: memref<8x128xf32, #tpu.memory_space<vmem>>, %arg7: memref<1x1x1xf32, #tpu.memory_space<vmem>>, %arg8: memref<16x128xf32, #tpu.memory_space<vmem>>, %arg9: memref<1xf32, #tpu.memory_space<smem>>) attributes {dimension_semantics = [#tpu.dimension_semantics<parallel>, #tpu.dimension_semantics<arbitrary>], iteration_bounds = array<i64: 1, 1>, scalar_prefetch = 0 : i64, scratch_operands = 2 : i64, tpu.core_type = #tpu.core_type<tc>, window_params = [{transform_indices = @transform_0, window_bounds = array<i64: 16, 8>}, {transform_indices = @transform_1, window_bounds = array<i64: 16, 4>}, {transform_indices = @transform_2, window_bounds = array<i64: 16, 1>}, {transform_indices = @transform_3, window_bounds = array<i64: 8, 128>}, {transform_indices = @transform_4, window_bounds = array<i64: 8, 128>}, {transform_indices = @transform_5, window_bounds = array<i64: 1, 1, 1>}]} {
    %c0_i32 = arith.constant 0 : i32
    %0 = arith.cmpi eq, %arg1, %c0_i32 : i32
    %1 = arith.extui %0 : i1 to i32
    %c0_i32_0 = arith.constant 0 : i32
    %2 = arith.cmpi ne, %1, %c0_i32_0 : i32
    scf.if %2 {
      %cst_17 = arith.constant 0x7F800000 : f32
      %39 = vector.broadcast %cst_17 : f32 to vector<16x128xf32>
      %c0_18 = arith.constant 0 : index
      %c0_19 = arith.constant 0 : index
      %40 = vector.load %arg8[%c0_18, %c0_19] : memref<16x128xf32, #tpu.memory_space<vmem>>, vector<16x128xf32>
      tpu.vector_store %arg8[%c0_18, %c0_19], %39 {strides = array<i32>} : memref<16x128xf32, #tpu.memory_space<vmem>>, vector<16x128xf32>,
      %c0_20 = arith.constant 0 : index
      %c0_21 = arith.constant 0 : index
      %41 = vector.load %arg3[%c0_20, %c0_21] : memref<16x4xf32, #tpu.memory_space<vmem>>, vector<16x4xf32>
      %c0_22 = arith.constant 0 : index
      %c0_23 = arith.constant 0 : index
      %42 = vector.load %arg4[%c0_22, %c0_23] : memref<16x1xi32, #tpu.memory_space<vmem>>, vector<16x1xi32>
      %c16_i32_24 = arith.constant 16 : i32
      %43 = arith.muli %arg0, %c16_i32_24 : i32
      %44 = tpu.iota {dimensions = array<i32: 0>} : vector<16x1xi32>
      %45 = vector.broadcast %43 : i32 to vector<16x1xi32>
      %46 = arith.addi %45, %44 : vector<16x1xi32>
      %c16_i32_25 = arith.constant 16 : i32
      %47 = vector.broadcast %c16_i32_25 : i32 to vector<16x1xi32>
      %48 = arith.cmpi slt, %46, %47 : vector<16x1xi32>
      %cst_26 = arith.constant dense<0xFF800000> : vector<16xf32>
      %49 = vector.multi_reduction <maximumf>, %41, %cst_26 [1] : vector<16x4xf32> to vector<16xf32>
      %50 = vector.shape_cast %49 : vector<16xf32> to vector<16x1xf32>
      %51 = vector.broadcast %50 : vector<16x1xf32> to vector<16x4xf32>
      %52 = arith.subf %41, %51 : vector<16x4xf32>
      %53 = math.exp %52 : vector<16x4xf32>
      %cst_27 = arith.constant dense<0.000000e+00> : vector<16xf32>
      %54 = vector.multi_reduction <add>, %53, %cst_27 [1] : vector<16x4xf32> to vector<16xf32>
      %55 = vector.shape_cast %54 : vector<16xf32> to vector<16x1xf32>
      %56 = math.log %55 : vector<16x1xf32>
      %57 = arith.addf %56, %50 : vector<16x1xf32>
      %58 = tpu.iota {dimensions = array<i32: 1>} : vector<16x4xi32>
      %59 = vector.broadcast %42 : vector<16x1xi32> to vector<16x4xi32>
      %60 = arith.cmpi eq, %58, %59 : vector<16x4xi32>
      %cst_28 = arith.constant 0.000000e+00 : f32
      %61 = vector.broadcast %cst_28 : f32 to vector<16x4xf32>
      %62 = arith.select %60, %41, %61 : vector<16x4xi1>, vector<16x4xf32>
      %cst_29 = arith.constant dense<0.000000e+00> : vector<16xf32>
      %63 = vector.multi_reduction <add>, %62, %cst_29 [1] : vector<16x4xf32> to vector<16xf32>
      %64 = vector.shape_cast %63 : vector<16xf32> to vector<16x1xf32>
      %65 = arith.subf %57, %64 : vector<16x1xf32>
      %cst_30 = arith.constant 0.000000e+00 : f32
      %66 = vector.broadcast %cst_30 : f32 to vector<16x1xf32>
      %67 = arith.select %48, %65, %66 : vector<16x1xi1>, vector<16x1xf32>
      %68 = vector.shape_cast %67 : vector<16x1xf32> to vector<1x16x1xf32>
      %cst_31 = arith.constant dense<0.000000e+00> : vector<1xf32>
      %69 = vector.multi_reduction <add>, %68, %cst_31 [1, 2] : vector<1x16x1xf32> to vector<1xf32>
      %70 = vector.shape_cast %69 : vector<1xf32> to vector<1x1x1xf32>
      %71 = vector.extract %70[0, 0, 0] : f32 from vector<1x1x1xf32>
      %cst_32 = arith.constant 3.906250e-03 : f32
      %72 = arith.mulf %cst_32, %71 : f32
      %c0_33 = arith.constant 0 : index
      %73 = memref.load %arg9[%c0_33] : memref<1xf32, #tpu.memory_space<smem>>
      memref.store %72, %arg9[%c0_33] : memref<1xf32, #tpu.memory_space<smem>>
    } else {
    }
    %c0 = arith.constant 0 : index
    %c0_1 = arith.constant 0 : index
    %3 = vector.load %arg2[%c0, %c0_1] : memref<16x8xf32, #tpu.memory_space<vmem>>, vector<16x8xf32>
    %c0_2 = arith.constant 0 : index
    %c0_3 = arith.constant 0 : index
    %4 = vector.load %arg6[%c0_2, %c0_3] : memref<8x128xf32, #tpu.memory_space<vmem>>, vector<8x128xf32>
    %cst = arith.constant dense<0.000000e+00> : vector<16x128xf32>
    %5 = tpu.matmul %3, %4, %cst {dimension_numbers = #tpu.dot_dimension_numbers<[1], [0], [0], [1], [0, 0, 1, 1], [], []>, precision = #tpu.contract_precision<fp32>} : vector<16x8xf32>, vector<8x128xf32>, vector<16x128xf32> -> vector<16x128xf32>
    %6 = arith.mulf %3, %3 : vector<16x8xf32>
    %cst_4 = arith.constant dense<0.000000e+00> : vector<16xf32>
    %7 = vector.multi_reduction <add>, %6, %cst_4 [1] : vector<16x8xf32> to vector<16xf32>
    %8 = vector.shape_cast %7 : vector<16xf32> to vector<16x1xf32>
    %9 = arith.mulf %4, %4 : vector<8x128xf32>
    %cst_5 = arith.constant dense<0.000000e+00> : vector<128xf32>
    %10 = vector.multi_reduction <add>, %9, %cst_5 [0] : vector<8x128xf32> to vector<128xf32>
    %11 = vector.shape_cast %10 : vector<128xf32> to vector<1x128xf32>
    %12 = vector.broadcast %8 : vector<16x1xf32> to vector<16x128xf32>
    %13 = vector.broadcast %11 : vector<1x128xf32> to vector<16x128xf32>
    %14 = arith.addf %12, %13 : vector<16x128xf32>
    %cst_6 = arith.constant 2.000000e+00 : f32
    %15 = vector.broadcast %cst_6 : f32 to vector<16x128xf32>
    %16 = arith.mulf %15, %5 : vector<16x128xf32>
    %17 = arith.subf %14, %16 : vector<16x128xf32>
    %cst_7 = arith.constant 0.000000e+00 : f32
    %18 = vector.broadcast %cst_7 : f32 to vector<16x128xf32>
    %19 = arith.maximumf %17, %18 : vector<16x128xf32>
    %c128_i32 = arith.constant 128 : i32
    %20 = arith.muli %arg1, %c128_i32 : i32
    %21 = tpu.iota {dimensions = array<i32: 1>} : vector<1x128xi32>
    %22 = vector.broadcast %20 : i32 to vector<1x128xi32>
    %23 = arith.addi %22, %21 : vector<1x128xi32>
    %c16_i32 = arith.constant 16 : i32
    %24 = vector.broadcast %c16_i32 : i32 to vector<1x128xi32>
    %25 = arith.cmpi slt, %23, %24 : vector<1x128xi32>
    %cst_8 = arith.constant 0x7F800000 : f32
    %26 = vector.shape_cast %25 : vector<1x128xi1> to vector<1x128xi1>
    %27 = vector.broadcast %26 : vector<1x128xi1> to vector<16x128xi1>
    %28 = vector.broadcast %cst_8 : f32 to vector<16x128xf32>
    %29 = arith.select %27, %19, %28 : vector<16x128xi1>, vector<16x128xf32>
    %c0_9 = arith.constant 0 : index
    %c0_10 = arith.constant 0 : index
    %30 = vector.load %arg8[%c0_9, %c0_10] : memref<16x128xf32, #tpu.memory_space<vmem>>, vector<16x128xf32>
    %31 = arith.minimumf %30, %29 : vector<16x128xf32>
    %c0_11 = arith.constant 0 : index
    %c0_12 = arith.constant 0 : index
    %32 = vector.load %arg8[%c0_11, %c0_12] : memref<16x128xf32, #tpu.memory_space<vmem>>, vector<16x128xf32>
    tpu.vector_store %arg8[%c0_11, %c0_12], %31 {strides = array<i32>} : memref<16x128xf32, #tpu.memory_space<vmem>>, vector<16x128xf32>,
    %c0_i32_13 = arith.constant 0 : i32
    %33 = arith.cmpi eq, %arg0, %c0_i32_13 : i32
    %34 = arith.extui %33 : i1 to i32
    %c0_i32_14 = arith.constant 0 : i32
    %35 = arith.cmpi ne, %34, %c0_i32_14 : i32
    scf.if %35 {
      %c0_17 = arith.constant 0 : index
      %c0_18 = arith.constant 0 : index
      %39 = vector.load %arg5[%c0_17, %c0_18] : memref<8x128xf32, #tpu.memory_space<vmem>>, vector<8x128xf32>
      %c0_19 = arith.constant 0 : index
      %c0_20 = arith.constant 0 : index
      %40 = vector.load %arg6[%c0_19, %c0_20] : memref<8x128xf32, #tpu.memory_space<vmem>>, vector<8x128xf32>
      %41 = arith.subf %39, %40 : vector<8x128xf32>
      %42 = math.absf %41 : vector<8x128xf32>
      %c0_21 = arith.constant 0 : index
      %43 = memref.load %arg9[%c0_21] : memref<1xf32, #tpu.memory_space<smem>>
      %44 = vector.shape_cast %42 : vector<8x128xf32> to vector<1x8x128xf32>
      %cst_22 = arith.constant dense<0.000000e+00> : vector<1xf32>
      %45 = vector.multi_reduction <add>, %44, %cst_22 [1, 2] : vector<1x8x128xf32> to vector<1xf32>
      %46 = vector.shape_cast %45 : vector<1xf32> to vector<1x1x1xf32>
      %47 = vector.extract %46[0, 0, 0] : f32 from vector<1x1x1xf32>
      %cst_23 = arith.constant 6.250000e-02 : f32
      %48 = arith.mulf %cst_23, %47 : f32
      %49 = arith.addf %43, %48 : f32
      %c0_24 = arith.constant 0 : index
      %50 = memref.load %arg9[%c0_24] : memref<1xf32, #tpu.memory_space<smem>>
      memref.store %49, %arg9[%c0_24] : memref<1xf32, #tpu.memory_space<smem>>
    } else {
    }
    %c0_i32_15 = arith.constant 0 : i32
    %36 = arith.cmpi eq, %arg1, %c0_i32_15 : i32
    %37 = arith.extui %36 : i1 to i32
    %c0_i32_16 = arith.constant 0 : i32
    %38 = arith.cmpi ne, %37, %c0_i32_16 : i32
    scf.if %38 {
      %c16_i32_17 = arith.constant 16 : i32
      %39 = arith.muli %arg0, %c16_i32_17 : i32
      %40 = tpu.iota {dimensions = array<i32: 0>} : vector<16x1xi32>
      %41 = vector.broadcast %39 : i32 to vector<16x1xi32>
      %42 = arith.addi %41, %40 : vector<16x1xi32>
      %c16_i32_18 = arith.constant 16 : i32
      %43 = vector.broadcast %c16_i32_18 : i32 to vector<16x1xi32>
      %44 = arith.cmpi slt, %42, %43 : vector<16x1xi32>
      %c0_19 = arith.constant 0 : index
      %c0_20 = arith.constant 0 : index
      %45 = vector.load %arg8[%c0_19, %c0_20] : memref<16x128xf32, #tpu.memory_space<vmem>>, vector<16x128xf32>
      %cst_21 = arith.constant dense<0x7F800000> : vector<16xf32>
      %46 = vector.multi_reduction <minimumf>, %45, %cst_21 [1] : vector<16x128xf32> to vector<16xf32>
      %47 = vector.shape_cast %46 : vector<16xf32> to vector<16x1xf32>
      %48 = math.sqrt %47 : vector<16x1xf32>
      %cst_22 = arith.constant 0.000000e+00 : f32
      %49 = vector.broadcast %cst_22 : f32 to vector<16x1xf32>
      %50 = arith.select %44, %48, %49 : vector<16x1xi1>, vector<16x1xf32>
      %c0_23 = arith.constant 0 : index
      %51 = memref.load %arg9[%c0_23] : memref<1xf32, #tpu.memory_space<smem>>
      %52 = vector.shape_cast %50 : vector<16x1xf32> to vector<1x16x1xf32>
      %cst_24 = arith.constant dense<0.000000e+00> : vector<1xf32>
      %53 = vector.multi_reduction <add>, %52, %cst_24 [1, 2] : vector<1x16x1xf32> to vector<1xf32>
      %54 = vector.shape_cast %53 : vector<1xf32> to vector<1x1x1xf32>
      %55 = vector.extract %54[0, 0, 0] : f32 from vector<1x1x1xf32>
      %cst_25 = arith.constant 6.250000e-02 : f32
      %56 = arith.mulf %cst_25, %55 : f32
      %57 = arith.addf %51, %56 : f32
      %58 = vector.broadcast %57 : f32 to vector<1x1x1xf32>
      %c0_26 = arith.constant 0 : index
      %c0_27 = arith.constant 0 : index
      %c0_28 = arith.constant 0 : index
      %59 = vector.load %arg7[%c0_26, %c0_27, %c0_28] : memref<1x1x1xf32, #tpu.memory_space<vmem>>, vector<1x1x1xf32>
      tpu.vector_store %arg7[%c0_26, %c0_27, %c0_28], %58 {strides = array<i32>} : memref<1x1x1xf32, #tpu.memory_space<vmem>>, vector<1x1x1xf32>,
    } else {
    }
    return
  }
  func.func @transform_0(%arg0: i32, %arg1: i32) -> (i32, i32) {
    %c0_i32 = arith.constant 0 : i32
    %c0_i32_0 = arith.constant 0 : i32
    return %arg0, %c0_i32 : i32, i32
  }
  func.func @transform_1(%arg0: i32, %arg1: i32) -> (i32, i32) {
    %c0_i32 = arith.constant 0 : i32
    %c0_i32_0 = arith.constant 0 : i32
    return %arg0, %c0_i32 : i32, i32
  }
  func.func @transform_2(%arg0: i32, %arg1: i32) -> (i32, i32) {
    %c0_i32 = arith.constant 0 : i32
    %c0_i32_0 = arith.constant 0 : i32
    return %arg0, %c0_i32 : i32, i32
  }
  func.func @transform_3(%arg0: i32, %arg1: i32) -> (i32, i32) {
    %c0_i32 = arith.constant 0 : i32
    %c0_i32_0 = arith.constant 0 : i32
    return %c0_i32, %arg1 : i32, i32
  }
  func.func @transform_4(%arg0: i32, %arg1: i32) -> (i32, i32) {
    %c0_i32 = arith.constant 0 : i32
    %c0_i32_0 = arith.constant 0 : i32
    return %c0_i32, %arg1 : i32, i32
  }
  func.func @transform_5(%arg0: i32, %arg1: i32) -> (i32, i32, i32) {
    %c0_i32 = arith.constant 0 : i32
    %c0_i32_0 = arith.constant 0 : i32
    %c0_i32_1 = arith.constant 0 : i32
    return %arg0, %c0_i32, %c0_i32_0 : i32, i32, i32
  }
}

</mosaic_0001>

<bundles_post_ra>
// kernel: tpu_custom_call.1
= control target key start
LH: loop header
LB: loop body
LE: loop exit
PB: predicated region body
PF: predicated region fallthrough
CT: control target
= control target key end

     0   :  { %vm40_vm0 = vcmask 31744   ;;  %vm106_vm1 = vcmask 64512   ;;  %v834_v7 = vmov 0   ;;  %s941_s0 = inlined_call_operand.vmem [shape: f32[16,8], index: 0, kind: input, shape index: {}]   ;;  %s942_s1 = inlined_call_operand.vmem [shape: f32[16,4], index: 1, kind: input, shape index: {}]   ;;  %s943_s2 = inlined_call_operand.vmem [shape: s32[16,1], index: 2, kind: input, shape index: {}]   ;;  %s944_s3 = inlined_call_operand.vmem [shape: f32[8,128], index: 3, kind: input, shape index: {}]   ;;  %s945_s4 = inlined_call_operand.vmem [shape: f32[8,128], index: 4, kind: input, shape index: {}]   ;;  %s946_s5 = inlined_call_operand.hbm [shape: f32[1,1,1], index: 5, kind: output, shape index: {}]  }
   0x1   :  { %v869_v0 = vld [vmem:[%s942_s1] sm:$0xff]  ;;  %v874_v1 = vld [vmem:[%s942_s1 + $0x8] sm:$0xff]  ;;  %797 = vset.pattern.permute.xlu1 %v834_v7  ;;  %796 = vset.pattern.permute.xlu0 %v834_v7 }
   0x2   :  { %v879_v2 = vld [vmem:[%s945_s4] sm:$0xff]  ;;  %v41_v3 = vsel %vm40_vm0, %v869_v0, -inf  ;;  %v104_v6 = vld [vmem:[%s941_s0 + $0x8] sm:$0xff] }
   0x3   :  { %v114_v4 = vand.u32 4294901760, %v879_v2  ;;  %v103_v5 = vld [vmem:[%s941_s0] sm:$0xff]  ;;  %42 = vmax.xlane.f32.xlu0 %v41_v3  ;;  %v111_v9 = vsel %vm106_vm1, %v104_v6, 0  ;;  %v603_v11 = vmul.f32 %v104_v6, %v104_v6 }
   0x4   :  { %v108_v8 = vsel %vm106_vm1, %v103_v5, 0  ;;  %v602_v10 = vmul.f32 %v103_v5, %v103_v5 }
   0x5   :  { %10 = vsyncpa [#allocation5], 0  ;;  %v44_v12 = vsel %vm40_vm0, %v874_v1, -inf  ;;  %763 = vmatprep.subr.mxu0 %v114_v4  ;;  %v179_v13 = vand.u32 4294901760, %v108_v8  ;;  %v189_v14 = vand.u32 4294901760, %v111_v9  ;;  %748 = vmatprep.subr.mxu1 %v114_v4  ;;  %v201_v15 = vsub.f32 %v879_v2, %v114_v4  ;;  %v30_v29 = vld [vmem:[%s943_s2 + $0x8] sm:$0xff] }
   0x6   :  { %764 = vmatpush3.msra.mxu0 %v114_v4  ;;  %749 = vmatpush3.msra.mxu1 %v114_v4  ;;  %v604_v16 = vsel %vm106_vm1, %v602_v10, 0.0  ;;  %v607_v20 = vsel %vm106_vm1, %v603_v11, 0.0  ;;  %v29_v30 = vld [vmem:[%s943_s2] sm:$0xff]  ;;  %v610_v41 = vmul.f32 %v879_v2, %v879_v2  ;;  %v65_v52 = vlaneseq  ;;  %s835_s11 = smov [#allocation4]  }
   0x7   :  { %v180_v17 = vsub.f32 %v108_v8, %v179_v13  ;;  %v190_v18 = vsub.f32 %v111_v9, %v189_v14  ;;  %v202_v19 = vand.u32 4294901760, %v201_v15  ;;  %605 = vadd.xlane.f32.xlu1 %v604_v16  ;;  %45 = vmax.xlane.f32.xlu0 %v44_v12  ;;  %vm87_vm5 = vcmask 7168   ;;  %s722_s12 = sshll.u32 %s835_s11, 4  ;;  %s723_s12 = int_to_ptr.vmem [resolvable:$true] %s722_s12 }
   0x8   :  { %v611_v42 = vrot.slane %v610_v41, 4  ;;  %v66_v60 = vand.u32 127, %v65_v52  ;;  %vm714_vm10 = vcmask 0   ;;  %s810_s14 = scalar_lea.vmem %s723_s12, 16  ;;  %s814_s15 = scalar_lea.vmem %s723_s12, 32 }
   0x9   :  { %v181_v21 = vand.u32 4294901760, %v180_v17  ;;  %v191_v22 = vand.u32 4294901760, %v190_v18  ;;  %v203_v23 = vsub.f32 %v201_v15, %v202_v19  ;;  %768 = vmatprep.subr.mxu0 %v202_v19  ;;  %p811_p0 = scmp.ne.s32.totalorder %s723_s12, %s810_s14  ;;  %p815_p1 = scmp.lt.s32.totalorder %s723_s12, %s723_s12 }
   0xa   :  { %v612_v43 = vadd.f32 %v611_v42, %v610_v41  ;;  %vm630_vm2 = vcmp.lt.s32.totalorder %v66_v60, 16  ;;  %p816_p2 = scmp.lt.s32.totalorder %s814_s15, %s810_s14 }
   0xb   :  { %765 = vmatprep.mubr.f32.mxu0 %v181_v21  ;;  %v182_v24 = vsub.f32 %v180_v17, %v181_v21  ;;  %v204_v25 = vand.u32 4294901760, %v203_v23  ;;  %v192_v26 = vsub.f32 %v190_v18, %v191_v22  ;;  %608 = vadd.xlane.f32.xlu1 %v607_v20 }
   0xc   :  { %766 = vmatmul.mubr.f32.vlgmr.msra.gmra.mrb[0].mxu0 %v191_v22  ;;  %v613_v44 = vrot.slane %v612_v43, 2  ;;  %p817_p3 = por %p816_p2, %p815_p1 }
   0xd   :  { %v183_v27 = vand.u32 4294901760, %v182_v24  ;;  %753 = vmatprep.subr.mxu1 %v204_v25  ;;  %v193_v28 = vand.u32 4294901760, %v192_v26  ;;  %769 = vmatpush3.msra.mxu0 %v202_v19  ;;  %v645_v24 = vld [vmem:[%s944_s3] sm:$0xff] }
   0xe   :  { %770 = vmatprep.mubr.f32.mxu0 %v179_v13  ;;  %773 = vmatprep.subr.mxu0 %v114_v4  ;;  %v614_v45 = vadd.f32 %v613_v44, %v612_v43  ;;  %p818_p4 = pnand %p817_p3, %p811_p0 }
   0xf   :  { %750 = vmatprep.mubr.f32.mxu1 %v183_v27 }
  0x10   :  { %751 = vmatmul.mubr.f32.vlgmr.msra.gmra.mrb[0].mxu1 %v193_v28  ;;  %v615_v47 = vrot.slane %v614_v45, 1  ;;  %v647_v28 = vsub.f32 %v645_v24, %v879_v2 }
  0x11   :  { %754 = vmatpush3.msra.mxu1 %v204_v25  ;;  %755 = vmatprep.mubr.f32.mxu1 %v179_v13 }
  0x12   :  { %758 = vmatprep.subr.mxu1 %v201_v15  ;;  %v616_v50 = vadd.f32 %v615_v47, %v614_v45 }
  0x14   :  { %771 = vmatmul.mubr.f32.vlgmr.msra.gmra.mrb[0].mxu0 %v189_v14 }
  0x15   :  { %774 = vmatpush3.msra.mxu0 %v114_v4  ;;  %775 = vmatprep.mubr.f32.mxu0 %v179_v13 }
  0x18   :  { %756 = vmatmul.mubr.f32.vlgmr.msra.gmra.mrb[0].mxu1 %v189_v14 }
  0x19   :  { %759 = vmatpush3.msra.mxu1 %v201_v15  ;;  %760 = vmatprep.mubr.f32.mxu1 %v180_v17 }
  0x1c   :  { %776 = vmatmul.mubr.f32.vlgmr.msra.gmra.mrb[0].mxu0 %v189_v14  ;;  %71 = vperm.xlu1 %797, %v30_v29  }
  0x1d   :  { %68 = vperm.xlu0 %796, %v29_v30  }
  0x20   :  { %761 = vmatmul.mubr.f32.vlgmr.msra.gmra.mrb[0].mxu1 %v190_v18 }
  0x90   :  { %v903_v31 = vpop.xlane.xlu0 %42 }
  0x91   :  { %v47_v32 = vsub.f32 %v869_v0, %v903_v31 }
  0x93   :  { %v49_v33 = vmul.f32 1.442695, %v47_v32 }
  0x94   :  { %v907_v34 = vpop.xlane.xlu0 %45  ;;  %v606_v46 = vpop.xlane.xlu1 %605 }
  0x95   :  { %798 = vpow2.f32 %v49_v33  ;;  %v48_v35 = vsub.f32 %v874_v1, %v907_v34  ;;  %v617_v56 = vadd.f32 %v616_v50, %v606_v46 }
  0x97   :  { %v51_v36 = vmul.f32 1.442695, %v48_v35 }
  0x98   :  { %v609_v51 = vpop.xlane.xlu1 %608 }
  0x99   :  { %800 = vpow2.f32 %v51_v36  ;;  %v618_v58 = vadd.f32 %v616_v50, %v609_v51 }
  0x9c   :  { %v69_v3 = vpop.permute.xlu0 %68  ;;  %v72_v7 = vpop.permute.xlu1 %71 }
  0x9d   :  { %vm73_vm3 = vcmp.eq.s32.totalorder %v66_v60, %v69_v3  ;;  %vm74_vm4 = vcmp.eq.s32.totalorder %v66_v60, %v72_v7 }
  0x9e   :  { %v75_v8 = vsel %vm73_vm3, %v869_v0, 0.0  ;;  %v76_v11 = vsel %vm74_vm4, %v874_v1, 0.0 }
  0x9f   :  { %v799_v37 = vpop.eup %798  ;;  %v77_v10 = vsel %vm40_vm0, %v75_v8, 0.0  ;;  %v80_v12 = vsel %vm40_vm0, %v76_v11, 0.0 }
  0xa0   :  { %v53_v38 = vsel %vm40_vm0, %v799_v37, 0.0 }
  0xa1   :  { %54 = vadd.xlane.f32.xlu1 %v53_v38  ;;  %v648_v38 = vand.u32 2147483647, %v647_v28 }
  0xa3   :  { %v801_v39 = vpop.eup %800 }
  0xa4   :  { %v56_v40 = vsel %vm40_vm0, %v801_v39, 0.0 }
  0xa5   :  { %57 = vadd.xlane.f32.xlu0 %v56_v40 }
  0xef   :  { %v777_v48 = vpop.f32.mrb[0].mxu0 }
  0xf0   :  { %v592_v49 = vpop.f32.mrb[1].mxu0 }
  0xf3   :  { %v762_v53 = vpop.f32.mrb[0].mxu1 }
  0xf4   :  { %v778_v54 = vadd.f32 %v777_v48, %v762_v53  ;;  %v351_v55 = vpop.f32.mrb[1].mxu1 }
  0xf5   :  { %v779_v57 = vadd.f32 %v592_v49, %v351_v55 }
  0xf6   :  { %v620_v59 = vmul.f32 2.0, %v778_v54 }
  0xf7   :  { %v619_v61 = vmul.f32 2.0, %v779_v57 }
  0xf8   :  { %v622_v62 = vsub.f32 %v618_v58, %v620_v59 }
  0xf9   :  { %v621_v63 = vsub.f32 %v617_v56, %v619_v61 }
  0xfa   :  { %v624_v6 = vmax.f32 %v622_v62, 0.0 }
  0xfb   :  { %v623_v4 = vmax.f32 %v621_v63, 0.0 }
  0xfc   :  { %v634_v9 = vsel %vm630_vm2, %v624_v6, inf }
  0xfd   :  { %v633_v5 = vsel %vm630_vm2, %v623_v4, inf }
  0xfe   :  { %677 = vmin.xlane.f32.xlu1 %v633_v5 }
 0x102   :  { %679 = vmin.xlane.f32.xlu1 %v634_v9 }
 0x106   :  { %78 = vadd.xlane.f32.xlu1 %v77_v10 }
 0x10a   :  { %81 = vadd.xlane.f32.xlu1 %v80_v12 }
 0x12e   :  { %v55_v13 = vpop.xlane.xlu1 %54 }
 0x12f   :  { %802 = vlog2.f32 %v55_v13 }
 0x132   :  { %v58_v14 = vpop.xlane.xlu0 %57 }
 0x133   :  { %804 = vlog2.f32 %v58_v14 }
 0x139   :  { %v803_v16 = vpop.eup %802 }
 0x13a   :  { %v60_v18 = vmul.f32 0.6931472, %v803_v16 }
 0x13c   :  { %v63_v21 = vadd.f32 %v60_v18, %v903_v31 }
 0x13d   :  { %v805_v17 = vpop.eup %804 }
 0x13e   :  { %v62_v19 = vmul.f32 0.6931472, %v805_v17 }
 0x140   :  { %v64_v23 = vadd.f32 %v62_v19, %v907_v34 }
 0x18b   :  { %v678_v15 = vpop.xlane.xlu1 %677 }
 0x18c   :  { %806 = vrsqrt.f32 %v678_v15  ;;  %vm683_vm6 = vcmp.eq.f32.partialorder %v678_v15, inf  ;;  %v686_v33 = vand.u32 2147483648, %v678_v15  ;;  %vm685_vm7 = vcmp.eq.f32.partialorder %v678_v15, 0.0 }
 0x18f   :  { %v680_v0 = vpop.xlane.xlu1 %679 }
 0x190   :  { %808 = vrsqrt.f32 %v680_v0  ;;  %vm690_vm8 = vcmp.eq.f32.partialorder %v680_v0, inf  ;;  %v693_v37 = vand.u32 2147483648, %v680_v0  ;;  %vm692_vm9 = vcmp.eq.f32.partialorder %v680_v0, 0.0 }
 0x193   :  { %v79_v20 = vpop.xlane.xlu1 %78 }
 0x194   :  { %v83_v22 = vsub.f32 %v63_v21, %v79_v20 }
 0x196   :  { %v807_v1 = vpop.eup %806  ;;  %v88_v32 = vsel %vm87_vm5, %v83_v22, 0.0 }
 0x197   :  { %v82_v25 = vpop.xlane.xlu1 %81  ;;  %v682_v26 = vmul.f32 %v807_v1, %v678_v15 }
 0x198   :  { %v84_v27 = vsub.f32 %v64_v23, %v82_v25 }
 0x199   :  { %v684_v29 = vsel %vm683_vm6, %v678_v15, %v682_v26 }
 0x19a   :  { %v809_v30 = vpop.eup %808  ;;  %v89_v31 = vsel %vm87_vm5, %v84_v27, 0.0  ;;  %v687_v36 = vsel %vm685_vm7, %v686_v33, %v684_v29 }
 0x19b   :  { %v90_v35 = vadd.f32 %v89_v31, %v88_v32  ;;  %v689_v34 = vmul.f32 %v809_v30, %v680_v0  ;;  %v699_v2 = vsel %vm87_vm5, %v687_v36, 0.0 }
 0x19d   :  { %91 = vadd.xlane.f32.xlu1 %v90_v35  ;;  %v691_v39 = vsel %vm690_vm8, %v680_v0, %v689_v34 }
 0x19e   :  { %v694_v40 = vsel %vm692_vm9, %v693_v37, %v691_v39 }
 0x19f   :  { %v700_v41 = vsel %vm87_vm5, %v694_v40, 0.0 }
 0x1a0   :  { %v701_v42 = vadd.f32 %v700_v41, %v699_v2 }
 0x1a1   :  { %650 = vadd.xlane.f32.xlu1 %v648_v38 }
 0x1a2   :  { %702 = vadd.xlane.f32.xlu0 %v701_v42 }
 0x22a   :  { %v92_v43 = vpop.xlane.xlu1 %91 }
 0x22b   :  { %v93_v44 = vrot.slane %v92_v43, 4 }
 0x22d   :  { %v94_v45 = vadd.f32 %v93_v44, %v92_v43 }
 0x22e   :  { %v651_v46 = vpop.xlane.xlu1 %650 }
 0x22f   :  { %v95_v47 = vrot.slane %v94_v45, 2  ;;  %v652_v48 = vrot.slane %v651_v46, 4  ;;  %v703_v49 = vpop.xlane.xlu0 %702 }
 0x230   :  { %v704_v50 = vrot.slane %v703_v49, 4 }
 0x231   :  { %v653_v51 = vadd.f32 %v652_v48, %v651_v46  ;;  %v96_v52 = vadd.f32 %v95_v47, %v94_v45 }
 0x232   :  { %v705_v53 = vadd.f32 %v704_v50, %v703_v49 }
 0x233   :  { %v654_v54 = vrot.slane %v653_v51, 2  ;;  %v97_v55 = vrot.slane %v96_v52, 1 }
 0x234   :  { %v706_v56 = vrot.slane %v705_v53, 2 }
 0x235   :  { %v655_v57 = vadd.f32 %v654_v54, %v653_v51  ;;  %v98_v58 = vadd.f32 %v97_v55, %v96_v52 }
 0x236   :  { %v707_v59 = vadd.f32 %v706_v56, %v705_v53 }
 0x237   :  { %788 = vpush %v98_v58  ;;  %v656_v60 = vrot.slane %v655_v57, 1 }
 0x238   :  { %v708_v61 = vrot.slane %v707_v59, 1 }
 0x239   :  { %v657_v62 = vadd.f32 %v656_v60, %v655_v57 }
 0x23a   :  { %v709_v63 = vadd.f32 %v708_v61, %v707_v59 }
 0x23b   :  { %790 = vpush %v657_v62 }
 0x23c   :  { %792 = vpush %v709_v63 }
 0x268   :  { %s789_s3 = spop %788 }
 0x269   :  { %s100_s30 = smul.f32 0.00390625, %s789_s3 }
 0x26c   :  { %s791_s6 = spop %790 }
 0x26d   :  { %s659_s7 = smul.f32 0.0625, %s791_s6  ;;  %s793_s8 = spop %792 }
 0x26e   :  { %s711_s9 = smul.f32 0.0625, %s793_s8 }
 0x26f   :  { %s660_s10 = sadd.f32 %s659_s7, %s100_s30 }
 0x271   :  { %s712_s13 = sadd.f32 %s711_s9, %s660_s10 }
 0x273   :  { %v713_v3 = vstv %s712_s13 }
 0x274   :  { %715 = vst.msk [vmem:[#allocation4] sm:$0x1] %vm714_vm10, %v713_v3 }
 0x275   :  { %821 = shalt.err (!%p818_p4)
}
 0x276   :  { %s822_s18 = scalar_lea.hbm %s946_s5, 16 }
 0x277   :  { %p823_p5 = scmp.ne.s32.totalorder %s946_s5, %s822_s18  ;;  %p826_p6 = scmp.lt.u32.totalorder %s822_s18, %s946_s5 }
 0x279   :  { %p828_p7 = pnand %p826_p6, %p823_p5 }
 0x27b   :  { %831 = shalt.err (!%p828_p7)
}
 0x27c   :  { %725 = dma.vmem_to_hbm [thread:$0]  %s723_s12, 16, %s946_s5, [#allocation5]  }
 0x27d   :  { %832 = dma.done.wait [#allocation5], 16  }
 0x27e   :  { %833 = vsyncadd [#allocation5], 4294967280 }
 0x27f   :  { %729 = vsyncpa [#allocation5], 1 }

</bundles_post_ra>
